<compile_context>
chip_gen: v6e
topology: v6e:2x2x1
jax: 0.10.0
libtpu: 0.0.40
codegen_flags: <defaults>
</compile_context>

<pallas_src>
import functools

import jax
import jax.numpy as jnp
from jax.experimental import pallas as pl
from jax.experimental.pallas import tpu as pltpu

HIDDEN = 64           # per-network hidden width (torch spec)
FUSED_H = 2 * HIDDEN  # 128 lanes: actor hidden | critic hidden
OUT_PAD = 128         # lane-dense padded output width


def _round_up(n, m):
    return ((n + m - 1) // m) * m


def _actor_critic_fused_kernel(x_ref, w1_ref, b1_ref, w2_ref, b2_ref,
                               w3_ref, b3_ref, out_ref, *, action_dim):
    x = x_ref[...]

    # Layer 1 (actor | critic side by side), tanh.
    h = jnp.tanh(jnp.dot(x, w1_ref[...], preferred_element_type=jnp.float32)
                 + b1_ref[...])
    # Layer 2: block-diagonal W2 keeps the two networks independent, tanh.
    h = jnp.tanh(jnp.dot(h, w2_ref[...], preferred_element_type=jnp.float32)
                 + b2_ref[...])
    # Layer 3 heads packed into one lane-dense slab.
    y = jnp.dot(h, w3_ref[...], preferred_element_type=jnp.float32) + b3_ref[...]

    # Actor columns ( < action_dim ) get the Tanh head; critic column does not.
    cols = jax.lax.broadcasted_iota(jnp.int32, y.shape, 1)
    out = jnp.where(cols < action_dim, jnp.tanh(y), y)
    out_ref[...] = out.astype(out_ref.dtype)


def actor_critic_forward(x, params, *, block_rows=256):
    """Run the fused actor+critic MLP in a single tiled Pallas call.

    x:      (B, state_dim) float32
    params: dict of per-network weights (in, out) and biases (1, out)
    returns: (actor_out (B, action_dim), critic_out (B, 1))
    """
    B, state_dim = x.shape
    action_dim = params["aw3"].shape[1]
    assert action_dim + 1 <= OUT_PAD

    # ---- one-time weight packing (wrapper side, plain JAX) ----
    w1 = jnp.concatenate([params["aw1"], params["cw1"]], axis=1)     # (S, 128)
    b1 = jnp.concatenate([params["ab1"], params["cb1"]], axis=1)     # (1, 128)
    z = jnp.zeros((HIDDEN, HIDDEN), jnp.float32)
    w2 = jnp.block([[params["aw2"], z], [z, params["cw2"]]])         # (128, 128)
    b2 = jnp.concatenate([params["ab2"], params["cb2"]], axis=1)     # (1, 128)
    w3 = jnp.zeros((FUSED_H, OUT_PAD), jnp.float32)
    w3 = w3.at[:HIDDEN, :action_dim].set(params["aw3"])
    w3 = w3.at[HIDDEN:, action_dim:action_dim + 1].set(params["cw3"])
    b3 = jnp.zeros((1, OUT_PAD), jnp.float32)
    b3 = b3.at[:, :action_dim].set(params["ab3"])
    b3 = b3.at[:, action_dim:action_dim + 1].set(params["cb3"])

    # ---- batch tiling: pad B up to a multiple of the row tile ----
    tb = min(block_rows, _round_up(B, 8))
    bp = _round_up(B, tb)
    if bp != B:
        x = jnp.pad(x, ((0, bp - B), (0, 0)))
    grid = (bp // tb,)

    x_spec = pl.BlockSpec((tb, state_dim), lambda i: (i, 0))
    out_spec = pl.BlockSpec((tb, OUT_PAD), lambda i: (i, 0))
    # Weights/biases: full-array blocks with a constant index_map -> VMEM-resident.
    w_specs = [
        pl.BlockSpec(w1.shape, lambda i: (0, 0)),
        pl.BlockSpec(b1.shape, lambda i: (0, 0)),
        pl.BlockSpec(w2.shape, lambda i: (0, 0)),
        pl.BlockSpec(b2.shape, lambda i: (0, 0)),
        pl.BlockSpec(w3.shape, lambda i: (0, 0)),
        pl.BlockSpec(b3.shape, lambda i: (0, 0)),
    ]

    # VMEM budget: resident weights + double-buffered x/out tiles + activations.
    weight_bytes = 4 * (w1.size + b1.size + w2.size + b2.size + w3.size + b3.size)
    tile_bytes = 4 * tb * (state_dim + OUT_PAD)      # x tile + out tile
    act_bytes = 4 * tb * FUSED_H * 3                 # h1, h2, y temporaries
    needed = 2 * weight_bytes + 2 * tile_bytes + act_bytes + (2 << 20)
    vmem_limit = int(max(needed, 32 * 1024 * 1024))  # safe on v5e/v6e/v7x

    cost = pl.CostEstimate(
        flops=2 * bp * (state_dim * FUSED_H + FUSED_H * FUSED_H
                        + FUSED_H * OUT_PAD),
        transcendentals=bp * (FUSED_H + FUSED_H + action_dim),
        bytes_accessed=4 * (bp * state_dim + bp * OUT_PAD) + weight_bytes,
    )

    out = pl.pallas_call(
        functools.partial(_actor_critic_fused_kernel, action_dim=action_dim),
        out_shape=jax.ShapeDtypeStruct((bp, OUT_PAD), jnp.float32),
        grid=grid,
        in_specs=[x_spec] + w_specs,
        out_specs=out_spec,
        compiler_params=pltpu.CompilerParams(
            dimension_semantics=("parallel",),
            vmem_limit_bytes=vmem_limit),
        cost_estimate=cost,
    )(x, w1, b1, w2, b2, w3, b3)

    actor_out = out[:B, :action_dim]
    critic_out = out[:B, action_dim:action_dim + 1]
    return actor_out, critic_out


def init_params(key, state_dim, action_dim, hidden=HIDDEN):
    """Deterministic torch-Linear-style init (uniform +/- 1/sqrt(fan_in))."""
    def linear(key, fan_in, fan_out):
        kw, kb = jax.random.split(key)
        bound = 1.0 / jnp.sqrt(fan_in)
        w = jax.random.uniform(kw, (fan_in, fan_out), jnp.float32, -bound, bound)
        b = jax.random.uniform(kb, (1, fan_out), jnp.float32, -bound, bound)
        return w, b

    keys = jax.random.split(key, 6)
    p = {}
    p["aw1"], p["ab1"] = linear(keys[0], state_dim, hidden)
    p["aw2"], p["ab2"] = linear(keys[1], hidden, hidden)
    p["aw3"], p["ab3"] = linear(keys[2], hidden, action_dim)
    p["cw1"], p["cb1"] = linear(keys[3], state_dim, hidden)
    p["cw2"], p["cb2"] = linear(keys[4], hidden, hidden)
    p["cw3"], p["cb3"] = linear(keys[5], hidden, 1)
    return p


def actor_critic_reference(x, params):
    h = jnp.tanh(x @ params["aw1"] + params["ab1"])
    h = jnp.tanh(h @ params["aw2"] + params["ab2"])
    a = jnp.tanh(h @ params["aw3"] + params["ab3"])
    g = jnp.tanh(x @ params["cw1"] + params["cb1"])
    g = jnp.tanh(g @ params["cw2"] + params["cb2"])
    v = g @ params["cw3"] + params["cb3"]
    return a, v


if __name__ == "__main__":
    state_dim = 16
    action_dim = 4
    batch = 2
    action_std_init = 0.6
    has_continuous_action_space = True

    key = jax.random.PRNGKey(0)
    kx, kp, kx2 = jax.random.split(key, 3)

    x = jax.random.normal(kx, (batch, state_dim), jnp.float32)
    params = init_params(kp, state_dim, action_dim)

    # action_var buffer (constant, plain JAX)
    action_var = jnp.full((action_dim,), action_std_init * action_std_init,
                          dtype=jnp.float32)

    # Small-batch check (single tile, padded to the 8-row sublane minimum).
    actor_out, critic_out = actor_critic_forward(x, params)
    jax.block_until_ready((actor_out, critic_out))

    ref_a, ref_v = actor_critic_reference(x, params)
    assert actor_out.shape == (batch, action_dim)
    assert critic_out.shape == (batch, 1)
    assert jnp.allclose(actor_out, ref_a, atol=1e-5, rtol=1e-5)
    assert jnp.allclose(critic_out, ref_v, atol=1e-5, rtol=1e-5)
    assert action_var.shape == (action_dim,)

    # Multi-tile check: exercises the batch grid + ragged-tail padding path.
    x2 = jax.random.normal(kx2, (300, state_dim), jnp.float32)
    a2, v2 = actor_critic_forward(x2, params, block_rows=128)
    jax.block_until_ready((a2, v2))
    ra2, rv2 = actor_critic_reference(x2, params)
    assert a2.shape == (300, action_dim) and v2.shape == (300, 1)
    assert jnp.allclose(a2, ra2, atol=1e-5, rtol=1e-5)
    assert jnp.allclose(v2, rv2, atol=1e-5, rtol=1e-5)

    print("KERNEL_OK")
</pallas_src>

<mosaic_0001>
module attributes {stable_mosaic.version = 11 : i64} {
  func.func @_actor_critic_fused_kernel(%arg0: i32, %arg1: memref<8x16xf32, #tpu.memory_space<vmem>>, %arg2: memref<16x128xf32, #tpu.memory_space<vmem>>, %arg3: memref<1x128xf32, #tpu.memory_space<vmem>>, %arg4: memref<128x128xf32, #tpu.memory_space<vmem>>, %arg5: memref<1x128xf32, #tpu.memory_space<vmem>>, %arg6: memref<128x128xf32, #tpu.memory_space<vmem>>, %arg7: memref<1x128xf32, #tpu.memory_space<vmem>>, %arg8: memref<8x128xf32, #tpu.memory_space<vmem>>) attributes {dimension_semantics = [#tpu.dimension_semantics<parallel>], iteration_bounds = array<i64: 1>, scalar_prefetch = 0 : i64, scratch_operands = 0 : i64, tpu.core_type = #tpu.core_type<tc>, window_params = [{transform_indices = @transform_0, window_bounds = array<i64: 8, 16>}, {pipeline_mode = #tpu.pipeline_mode<synchronous>, transform_indices = @transform_1, window_bounds = array<i64: 16, 128>}, {pipeline_mode = #tpu.pipeline_mode<synchronous>, transform_indices = @transform_2, window_bounds = array<i64: 1, 128>}, {pipeline_mode = #tpu.pipeline_mode<synchronous>, transform_indices = @transform_3, window_bounds = array<i64: 128, 128>}, {pipeline_mode = #tpu.pipeline_mode<synchronous>, transform_indices = @transform_4, window_bounds = array<i64: 1, 128>}, {pipeline_mode = #tpu.pipeline_mode<synchronous>, transform_indices = @transform_5, window_bounds = array<i64: 128, 128>}, {pipeline_mode = #tpu.pipeline_mode<synchronous>, transform_indices = @transform_6, window_bounds = array<i64: 1, 128>}, {transform_indices = @transform_7, window_bounds = array<i64: 8, 128>}]} {
    %c0 = arith.constant 0 : index
    %c0_0 = arith.constant 0 : index
    %0 = vector.load %arg1[%c0, %c0_0] : memref<8x16xf32, #tpu.memory_space<vmem>>, vector<8x16xf32>
    %c0_1 = arith.constant 0 : index
    %c0_2 = arith.constant 0 : index
    %1 = vector.load %arg2[%c0_1, %c0_2] : memref<16x128xf32, #tpu.memory_space<vmem>>, vector<16x128xf32>
    %cst = arith.constant dense<0.000000e+00> : vector<8x128xf32>
    %2 = tpu.matmul %0, %1, %cst {dimension_numbers = #tpu.dot_dimension_numbers<[1], [0], [0], [1], [0, 0, 1, 1], [], []>} : vector<8x16xf32>, vector<16x128xf32>, vector<8x128xf32> -> vector<8x128xf32>
    %c0_3 = arith.constant 0 : index
    %c0_4 = arith.constant 0 : index
    %3 = vector.load %arg3[%c0_3, %c0_4] : memref<1x128xf32, #tpu.memory_space<vmem>>, vector<1x128xf32>
    %4 = vector.broadcast %3 : vector<1x128xf32> to vector<8x128xf32>
    %5 = arith.addf %2, %4 : vector<8x128xf32>
    %6 = math.tanh %5 : vector<8x128xf32>
    %c0_5 = arith.constant 0 : index
    %c0_6 = arith.constant 0 : index
    %7 = vector.load %arg4[%c0_5, %c0_6] : memref<128x128xf32, #tpu.memory_space<vmem>>, vector<128x128xf32>
    %cst_7 = arith.constant dense<0.000000e+00> : vector<8x128xf32>
    %8 = tpu.matmul %6, %7, %cst_7 {dimension_numbers = #tpu.dot_dimension_numbers<[1], [0], [0], [1], [0, 0, 1, 1], [], []>} : vector<8x128xf32>, vector<128x128xf32>, vector<8x128xf32> -> vector<8x128xf32>
    %c0_8 = arith.constant 0 : index
    %c0_9 = arith.constant 0 : index
    %9 = vector.load %arg5[%c0_8, %c0_9] : memref<1x128xf32, #tpu.memory_space<vmem>>, vector<1x128xf32>
    %10 = vector.broadcast %9 : vector<1x128xf32> to vector<8x128xf32>
    %11 = arith.addf %8, %10 : vector<8x128xf32>
    %12 = math.tanh %11 : vector<8x128xf32>
    %c0_10 = arith.constant 0 : index
    %c0_11 = arith.constant 0 : index
    %13 = vector.load %arg6[%c0_10, %c0_11] : memref<128x128xf32, #tpu.memory_space<vmem>>, vector<128x128xf32>
    %cst_12 = arith.constant dense<0.000000e+00> : vector<8x128xf32>
    %14 = tpu.matmul %12, %13, %cst_12 {dimension_numbers = #tpu.dot_dimension_numbers<[1], [0], [0], [1], [0, 0, 1, 1], [], []>} : vector<8x128xf32>, vector<128x128xf32>, vector<8x128xf32> -> vector<8x128xf32>
    %c0_13 = arith.constant 0 : index
    %c0_14 = arith.constant 0 : index
    %15 = vector.load %arg7[%c0_13, %c0_14] : memref<1x128xf32, #tpu.memory_space<vmem>>, vector<1x128xf32>
    %16 = vector.broadcast %15 : vector<1x128xf32> to vector<8x128xf32>
    %17 = arith.addf %14, %16 : vector<8x128xf32>
    %18 = tpu.iota {dimensions = array<i32: 1>} : vector<8x128xi32>
    %c4_i32 = arith.constant 4 : i32
    %19 = vector.broadcast %c4_i32 : i32 to vector<8x128xi32>
    %20 = arith.cmpi slt, %18, %19 : vector<8x128xi32>
    %21 = math.tanh %17 : vector<8x128xf32>
    %22 = arith.select %20, %21, %17 : vector<8x128xi1>, vector<8x128xf32>
    %c0_15 = arith.constant 0 : index
    %c0_16 = arith.constant 0 : index
    %23 = vector.load %arg8[%c0_15, %c0_16] : memref<8x128xf32, #tpu.memory_space<vmem>>, vector<8x128xf32>
    tpu.vector_store %arg8[%c0_15, %c0_16], %22 {strides = array<i32>} : memref<8x128xf32, #tpu.memory_space<vmem>>, vector<8x128xf32>,
    return
  }
  func.func @transform_0(%arg0: i32) -> (i32, i32) {
    %c0_i32 = arith.constant 0 : i32
    %c0_i32_0 = arith.constant 0 : i32
    return %arg0, %c0_i32 : i32, i32
  }
  func.func @transform_1(%arg0: i32) -> (i32, i32) {
    %c0_i32 = arith.constant 0 : i32
    %c0_i32_0 = arith.constant 0 : i32
    %c0_i32_1 = arith.constant 0 : i32
    return %c0_i32, %c0_i32_0 : i32, i32
  }
  func.func @transform_2(%arg0: i32) -> (i32, i32) {
    %c0_i32 = arith.constant 0 : i32
    %c0_i32_0 = arith.constant 0 : i32
    %c0_i32_1 = arith.constant 0 : i32
    return %c0_i32, %c0_i32_0 : i32, i32
  }
  func.func @transform_3(%arg0: i32) -> (i32, i32) {
    %c0_i32 = arith.constant 0 : i32
    %c0_i32_0 = arith.constant 0 : i32
    %c0_i32_1 = arith.constant 0 : i32
    return %c0_i32, %c0_i32_0 : i32, i32
  }
  func.func @transform_4(%arg0: i32) -> (i32, i32) {
    %c0_i32 = arith.constant 0 : i32
    %c0_i32_0 = arith.constant 0 : i32
    %c0_i32_1 = arith.constant 0 : i32
    return %c0_i32, %c0_i32_0 : i32, i32
  }
  func.func @transform_5(%arg0: i32) -> (i32, i32) {
    %c0_i32 = arith.constant 0 : i32
    %c0_i32_0 = arith.constant 0 : i32
    %c0_i32_1 = arith.constant 0 : i32
    return %c0_i32, %c0_i32_0 : i32, i32
  }
  func.func @transform_6(%arg0: i32) -> (i32, i32) {
    %c0_i32 = arith.constant 0 : i32
    %c0_i32_0 = arith.constant 0 : i32
    %c0_i32_1 = arith.constant 0 : i32
    return %c0_i32, %c0_i32_0 : i32, i32
  }
  func.func @transform_7(%arg0: i32) -> (i32, i32) {
    %c0_i32 = arith.constant 0 : i32
    %c0_i32_0 = arith.constant 0 : i32
    return %arg0, %c0_i32 : i32, i32
  }
}

</mosaic_0001>

<bundles_post_ra>
// kernel: tpu_custom_call.1
= control target key start
LH: loop header
LB: loop body
LE: loop exit
PB: predicated region body
PF: predicated region fallthrough
CT: control target
= control target key end

     0   :  { %12 = vsyncpa [#allocation3], 0  ;;  %s738_s0 = inlined_call_operand.hbm [shape: f32[8,16], index: 0, kind: input, shape index: {}]   ;;  %s739_s1 = inlined_call_operand.hbm [shape: f32[16,128], index: 1, kind: input, shape index: {}]   ;;  %s740_s2 = inlined_call_operand.vmem [shape: f32[1,128], index: 2, kind: input, shape index: {}]   ;;  %s741_s3 = inlined_call_operand.hbm [shape: f32[128,128], index: 3, kind: input, shape index: {}]   ;;  %s742_s4 = inlined_call_operand.vmem [shape: f32[1,128], index: 4, kind: input, shape index: {}]   ;;  %s743_s5 = inlined_call_operand.hbm [shape: f32[128,128], index: 5, kind: input, shape index: {}]   ;;  %s744_s6 = inlined_call_operand.vmem [shape: f32[1,128], index: 6, kind: input, shape index: {}]   ;;  %s745_s7 = inlined_call_operand.hbm [shape: f32[8,128], index: 7, kind: output, shape index: {}]  }
   0x1   :  { %13 = vsyncpa [#allocation6], 0 }
   0x2   :  { %14 = vsyncpa [#allocation9], 0 }
   0x3   :  { %15 = vsyncpa [#allocation4], 0  ;;  %s616_s24 = smov [#allocation5]  }
   0x4   :  { %s31_s25 = sshll.u32 %s616_s24, 4  ;;  %s32_s25 = int_to_ptr.vmem [resolvable:$true] %s31_s25 }
   0x5   :  { %s516_s26 = scalar_lea.vmem %s32_s25, 256  ;;  %p521_p1 = scmp.lt.s32.totalorder %s32_s25, %s32_s25 }
   0x6   :  { %p517_p0 = scmp.ne.s32.totalorder %s32_s25, %s516_s26  ;;  %p522_p2 = scmp.lt.s32.totalorder %s516_s26, %s516_s26 }
   0x8   :  { %p523_p3 = por %p522_p2, %p521_p1 }
   0xa   :  { %p524_p4 = pnand %p523_p3, %p517_p0 }
   0xc   :  { %527 = shalt.err (!%p524_p4)
}
   0xd   :  { %s617_s27 = smov 128   ;;  %s618_s28 = smov 8  }
   0xe   :  { %37 = dma.hbm_to_vmem [thread:$0]  %s739_s1, 256, %s32_s25, [#allocation6], %s617_s27, %s617_s27, %s618_s28  }
   0xf   :  { %s619_s8 = smov [#allocation2]   ;;  %s620_s10 = smov [#allocation7]  }
  0x10   :  { %s22_s9 = sshll.u32 %s619_s8, 4  ;;  %s45_s11 = sshll.u32 %s620_s10, 4  ;;  %s23_s9 = int_to_ptr.vmem [resolvable:$true] %s22_s9  ;;  %s46_s11 = int_to_ptr.vmem [resolvable:$true] %s45_s11 }
  0x11   :  { %s536_s12 = scalar_lea.vmem %s23_s9, 128  ;;  %p541_p6 = scmp.lt.s32.totalorder %s23_s9, %s23_s9 }
  0x12   :  { %p537_p5 = scmp.ne.s32.totalorder %s23_s9, %s536_s12  ;;  %p542_p7 = scmp.lt.s32.totalorder %s536_s12, %s536_s12 }
  0x14   :  { %p543_p8 = por %p542_p7, %p541_p6 }
  0x16   :  { %p544_p9 = pnand %p543_p8, %p537_p5 }
  0x18   :  { %547 = shalt.err (!%p544_p9)
}
  0x19   :  { %25 = dma.hbm_to_vmem [thread:$0]  %s738_s0, 128, %s23_s9, [#allocation3]  }
  0x1a   :  { %s556_s15 = scalar_lea.vmem %s46_s11, 2048  ;;  %p561_p11 = scmp.lt.s32.totalorder %s46_s11, %s46_s11 }
  0x1b   :  { %p557_p10 = scmp.ne.s32.totalorder %s46_s11, %s556_s15  ;;  %p562_p12 = scmp.lt.s32.totalorder %s556_s15, %s556_s15 }
  0x1d   :  { %p563_p13 = por %p562_p12, %p561_p11 }
  0x1f   :  { %p564_p0 = pnand %p563_p13, %p557_p10 }
  0x21   :  { %567 = shalt.err (!%p564_p0)
}
  0x22   :  { %51 = dma.hbm_to_vmem [thread:$0]  %s741_s3, 2048, %s46_s11, [#allocation6], %s617_s27, %s617_s27, %s618_s28  }
  0x23   :  { %s621_s17 = smov [#allocation8]  }
  0x24   :  { %s59_s18 = sshll.u32 %s621_s17, 4  ;;  %s60_s18 = int_to_ptr.vmem [resolvable:$true] %s59_s18 }
  0x25   :  { %s576_s19 = scalar_lea.vmem %s60_s18, 2048  ;;  %p581_p2 = scmp.lt.s32.totalorder %s60_s18, %s60_s18 }
  0x26   :  { %p577_p1 = scmp.ne.s32.totalorder %s60_s18, %s576_s19  ;;  %p582_p3 = scmp.lt.s32.totalorder %s576_s19, %s576_s19 }
  0x28   :  { %p583_p4 = por %p582_p3, %p581_p2 }
  0x2a   :  { %p584_p5 = pnand %p583_p4, %p577_p1 }
  0x2c   :  { %587 = shalt.err (!%p584_p5)
}
  0x2d   :  { %65 = dma.hbm_to_vmem [thread:$0]  %s743_s5, 2048, %s60_s18, [#allocation9], %s617_s27, %s617_s27, %s618_s28  }
  0x2e   :  { %608 = dma.done.wait [#allocation3], 128  }
  0x2f   :  { %609 = vsyncadd [#allocation3], 4294967168 }
  0x30   :  { %610 = dma.done.wait [#allocation6], 2304  }
  0x31   :  { %611 = vsyncadd [#allocation6], 4294964992 }
  0x32   :  { %612 = dma.done.wait [#allocation9], 2048  }
  0x33   :  { %613 = vsyncadd [#allocation9], 4294965248  ;;  %v622_v0 = vmov 0.0   ;;  %vm623_vm0 = vmmov 0   ;;  %v82_v1 = vld [vmem:[#allocation5 + $0x8] sm:$0xff]  ;;  %v81_v2 = vld [vmem:[#allocation5] sm:$0xff]  ;;  %v352_v50 = vlaneseq }
  0x34   :  { %416 = vmatprep.subr.mxu0 %v622_v0  ;;  %420 = vmatprep.mubr.msk.f32.mxu0 %vm623_vm0, %v622_v0  ;;  %v80_v3 = vld [vmem:[#allocation2] sm:$0xff]  ;;  %vm90_vm1 = vcmask 130048   ;;  %v180_v4 = vld [vmem:[#allocation7 + $0x78] sm:$0xff]  ;;  %v179_v5 = vld [vmem:[#allocation7 + $0x70] sm:$0xff]  ;;  %s624_s24 = smov [#allocation10]  }
  0x35   :  { %423 = vmatprep.subr.mxu1 %v622_v0  ;;  %455 = vmatprep.mubr.msk.f32.mxu1 %vm623_vm0, %v622_v0  ;;  %v178_v6 = vld [vmem:[#allocation7 + $0x68] sm:$0xff]  ;;  %v177_v7 = vld [vmem:[#allocation7 + $0x60] sm:$0xff]  ;;  %v176_v8 = vld [vmem:[#allocation7 + $0x58] sm:$0xff]  ;;  %v353_v51 = vand.u32 127, %v352_v50  ;;  %s364_s25 = sshll.u32 %s624_s24, 4  ;;  %s365_s25 = int_to_ptr.vmem [resolvable:$true] %s364_s25 }
  0x36   :  { %417 = vmatpush3.msra.mxu0 %v82_v1  ;;  %424 = vmatpush3.msra.mxu1 %v180_v4  ;;  %v175_v9 = vld [vmem:[#allocation7 + $0x50] sm:$0xff]  ;;  %v174_v10 = vld [vmem:[#allocation7 + $0x48] sm:$0xff]  ;;  %v173_v11 = vld [vmem:[#allocation7 + $0x40] sm:$0xff]  ;;  %p593_p7 = scmp.lt.s32.totalorder %s365_s25, %s365_s25 }
  0x37   :  { %418 = vmatprep.subr.mxu0 %v622_v0  ;;  %425 = vmatprep.subr.mxu1 %v622_v0  ;;  %v172_v12 = vld [vmem:[#allocation7 + $0x38] sm:$0xff]  ;;  %v171_v13 = vld [vmem:[#allocation7 + $0x30] sm:$0xff]  ;;  %v170_v14 = vld [vmem:[#allocation7 + $0x28] sm:$0xff]  ;;  %vm354_vm2 = vcmp.lt.s32.totalorder %v353_v51, 4 }
  0x38   :  { %419 = vmatpush3.msra.mxu0 %v81_v2  ;;  %426 = vmatpush3.msra.mxu1 %v179_v5  ;;  %v169_v15 = vld [vmem:[#allocation7 + $0x20] sm:$0xff]  ;;  %v168_v16 = vld [vmem:[#allocation7 + $0x18] sm:$0xff]  ;;  %v167_v17 = vld [vmem:[#allocation7 + $0x10] sm:$0xff] }
  0x39   :  { %421 = vmatmul.mubr.msk.f32.vlgmr.msra.gmra.mxu0 %vm90_vm1, %v80_v3  ;;  %427 = vmatprep.subr.mxu1 %v622_v0  ;;  %v166_v18 = vld [vmem:[#allocation7 + $0x8] sm:$0xff]  ;;  %v165_v19 = vld [vmem:[#allocation7] sm:$0xff]  ;;  %v274_v20 = vld [vmem:[#allocation8 + $0x78] sm:$0xff] }
  0x3a   :  { %458 = vmatprep.subr.mxu0 %v622_v0  ;;  %428 = vmatpush3.msra.mxu1 %v178_v6  ;;  %v273_v21 = vld [vmem:[#allocation8 + $0x70] sm:$0xff]  ;;  %v272_v22 = vld [vmem:[#allocation8 + $0x68] sm:$0xff]  ;;  %v271_v23 = vld [vmem:[#allocation8 + $0x60] sm:$0xff] }
  0x3b   :  { %490 = vmatprep.mubr.msk.f32.mxu0 %vm623_vm0, %v622_v0  ;;  %429 = vmatprep.subr.mxu1 %v622_v0  ;;  %v270_v24 = vld [vmem:[#allocation8 + $0x58] sm:$0xff]  ;;  %v269_v25 = vld [vmem:[#allocation8 + $0x50] sm:$0xff]  ;;  %v268_v26 = vld [vmem:[#allocation8 + $0x48] sm:$0xff] }
  0x3c   :  { %430 = vmatpush3.msra.mxu1 %v177_v7  ;;  %459 = vmatpush3.msra.mxu0 %v274_v20  ;;  %v375_v27 = vld [vmem:[%s740_s2] ss:$0 sm:$0xff]  ;;  %v267_v32 = vld [vmem:[#allocation8 + $0x40] sm:$0xff]  ;;  %v266_v33 = vld [vmem:[#allocation8 + $0x38] sm:$0xff] }
  0x3d   :  { %431 = vmatprep.subr.mxu1 %v622_v0  ;;  %460 = vmatprep.subr.mxu0 %v622_v0  ;;  %v265_v34 = vld [vmem:[#allocation8 + $0x30] sm:$0xff]  ;;  %v264_v35 = vld [vmem:[#allocation8 + $0x28] sm:$0xff]  ;;  %v263_v36 = vld [vmem:[#allocation8 + $0x20] sm:$0xff] }
  0x3e   :  { %432 = vmatpush3.msra.mxu1 %v176_v8  ;;  %461 = vmatpush3.msra.mxu0 %v273_v21  ;;  %v262_v37 = vld [vmem:[#allocation8 + $0x18] sm:$0xff]  ;;  %v261_v38 = vld [vmem:[#allocation8 + $0x10] sm:$0xff]  ;;  %v260_v39 = vld [vmem:[#allocation8 + $0x8] sm:$0xff] }
  0x3f   :  { %433 = vmatprep.subr.mxu1 %v622_v0  ;;  %462 = vmatprep.subr.mxu0 %v622_v0  ;;  %v259_v40 = vld [vmem:[#allocation8] sm:$0xff]  ;;  %v377_v41 = vld [vmem:[%s742_s4] ss:$0 sm:$0xff]  ;;  %s588_s4 = scalar_lea.vmem %s365_s25, 128 }
  0x40   :  { %434 = vmatpush3.msra.mxu1 %v175_v9  ;;  %463 = vmatpush3.msra.mxu0 %v272_v22  ;;  %v378_v46 = vld [vmem:[%s744_s6] ss:$0 sm:$0xff]  ;;  %p589_p6 = scmp.ne.s32.totalorder %s365_s25, %s588_s4  ;;  %p594_p8 = scmp.lt.s32.totalorder %s588_s4, %s588_s4 }
  0x41   :  { %435 = vmatprep.subr.mxu1 %v622_v0  ;;  %464 = vmatprep.subr.mxu0 %v622_v0 }
  0x42   :  { %436 = vmatpush3.msra.mxu1 %v174_v10  ;;  %465 = vmatpush3.msra.mxu0 %v271_v23  ;;  %p595_p9 = por %p594_p8, %p593_p7 }
  0x43   :  { %437 = vmatprep.subr.mxu1 %v622_v0  ;;  %466 = vmatprep.subr.mxu0 %v622_v0 }
  0x44   :  { %438 = vmatpush3.msra.mxu1 %v173_v11  ;;  %467 = vmatpush3.msra.mxu0 %v270_v24  ;;  %p596_p10 = pnand %p595_p9, %p589_p6 }
  0x45   :  { %439 = vmatprep.subr.mxu1 %v622_v0  ;;  %468 = vmatprep.subr.mxu0 %v622_v0 }
  0x46   :  { %440 = vmatpush3.msra.mxu1 %v172_v12  ;;  %469 = vmatpush3.msra.mxu0 %v269_v25 }
  0x47   :  { %441 = vmatprep.subr.mxu1 %v622_v0  ;;  %470 = vmatprep.subr.mxu0 %v622_v0 }
  0x48   :  { %442 = vmatpush3.msra.mxu1 %v171_v13  ;;  %471 = vmatpush3.msra.mxu0 %v268_v26 }
  0x49   :  { %443 = vmatprep.subr.mxu1 %v622_v0  ;;  %472 = vmatprep.subr.mxu0 %v622_v0 }
  0x4a   :  { %444 = vmatpush3.msra.mxu1 %v170_v14  ;;  %473 = vmatpush3.msra.mxu0 %v267_v32 }
  0x4b   :  { %445 = vmatprep.subr.mxu1 %v622_v0  ;;  %474 = vmatprep.subr.mxu0 %v622_v0 }
  0x4c   :  { %446 = vmatpush3.msra.mxu1 %v169_v15  ;;  %475 = vmatpush3.msra.mxu0 %v266_v33 }
  0x4d   :  { %447 = vmatprep.subr.mxu1 %v622_v0  ;;  %476 = vmatprep.subr.mxu0 %v622_v0 }
  0x4e   :  { %448 = vmatpush3.msra.mxu1 %v168_v16  ;;  %477 = vmatpush3.msra.mxu0 %v265_v34 }
  0x4f   :  { %449 = vmatprep.subr.mxu1 %v622_v0  ;;  %478 = vmatprep.subr.mxu0 %v622_v0 }
  0x50   :  { %450 = vmatpush3.msra.mxu1 %v167_v17  ;;  %479 = vmatpush3.msra.mxu0 %v264_v35 }
  0x51   :  { %451 = vmatprep.subr.mxu1 %v622_v0  ;;  %480 = vmatprep.subr.mxu0 %v622_v0 }
  0x52   :  { %452 = vmatpush3.msra.mxu1 %v166_v18  ;;  %481 = vmatpush3.msra.mxu0 %v263_v36 }
  0x53   :  { %453 = vmatprep.subr.mxu1 %v622_v0  ;;  %482 = vmatprep.subr.mxu0 %v622_v0 }
  0x54   :  { %454 = vmatpush3.msra.mxu1 %v165_v19  ;;  %483 = vmatpush3.msra.mxu0 %v262_v37 }
  0x55   :  { %484 = vmatprep.subr.mxu0 %v622_v0 }
  0x56   :  { %485 = vmatpush3.msra.mxu0 %v261_v38 }
  0x57   :  { %486 = vmatprep.subr.mxu0 %v622_v0 }
  0x58   :  { %487 = vmatpush3.msra.mxu0 %v260_v39 }
  0x59   :  { %488 = vmatprep.subr.mxu0 %v622_v0 }
  0x5a   :  { %489 = vmatpush3.msra.mxu0 %v259_v40 }
  0xf9   :  { %v160_v28 = vpop.f32.mrf.mxu0 }
  0xfa   :  { %v161_v29 = vadd.f32 %v375_v27, %v160_v28 }
  0xfb   :  { %v422_v30 = vpop.f32.mrf.mxu0 }
  0xfc   :  { %502 = vtanh.f32 %v161_v29 }
 0x109   :  { %v503_v31 = vpop.eup %502 }
 0x10a   :  { %456 = vmatmul.mubr.f32.vlgmr.msra.gmra.mxu1 %v503_v31 }
 0x1ca   :  { %v254_v42 = vpop.f32.mrf.mxu1 }
 0x1cb   :  { %v255_v43 = vadd.f32 %v377_v41, %v254_v42 }
 0x1cc   :  { %v457_v44 = vpop.f32.mrf.mxu1 }
 0x1cd   :  { %504 = vtanh.f32 %v255_v43 }
 0x1da   :  { %v505_v45 = vpop.eup %504 }
 0x1db   :  { %491 = vmatmul.mubr.f32.vlgmr.msra.gmra.mxu0 %v505_v45 }
 0x29b   :  { %v348_v47 = vpop.f32.mrf.mxu0 }
 0x29c   :  { %v349_v48 = vadd.f32 %v378_v46, %v348_v47 }
 0x29d   :  { %v492_v49 = vpop.f32.mrf.mxu0 }
 0x29e   :  { %506 = vtanh.f32 %v349_v48 }
 0x2ab   :  { %v507_v52 = vpop.eup %506 }
 0x2ac   :  { %v356_v53 = vsel %vm354_vm2, %v507_v52, %v349_v48 }
 0x2ad   :  { %357 = vst [vmem:[#allocation10] sm:$0xff] %v356_v53 }
 0x2ae   :  { %599 = shalt.err (!%p596_p10)
}
 0x2af   :  { %367 = dma.vmem_to_hbm [thread:$0]  %s365_s25, 128, %s745_s7, [#allocation4]  }
 0x2b0   :  { %614 = dma.done.wait [#allocation4], 128  }
 0x2b1   :  { %615 = vsyncadd [#allocation4], 4294967168 }
 0x2b2   :  { %371 = vsyncpa [#allocation3], 1 }
 0x2b3   :  { %372 = vsyncpa [#allocation6], 1 }
 0x2b4   :  { %373 = vsyncpa [#allocation9], 1 }
 0x2b5   :  { %374 = vsyncpa [#allocation4], 1 }

</bundles_post_ra>
